<compile_context>
chip_gen: v6e
topology: v6e:2x2x1
jax: 0.10.0
libtpu: 0.0.40
codegen_flags: <defaults>
</compile_context>

<pallas_src>
import jax
import jax.numpy as jnp
import numpy as np
from jax.experimental import pallas as pl
from jax.experimental.pallas import tpu as pltpu

FPAD = 128  # lane-dense padded feature width for activations / weights / outputs


# ----------------------------------------------------------------------------
# Fused kernel: per grid step (= G graphs) run every layer + pooling + FC head.
# ----------------------------------------------------------------------------
def _make_fused_kernel(n_layers):
    def kernel(x_ref, adj_ref, *rest):
        layer_refs = rest[: 3 * n_layers]            # (W_self, W_neigh, bias)/layer
        w1_ref, b1_ref, w2_ref, b2_ref, o_ref = rest[3 * n_layers:]

        G, N, F = x_ref.shape
        adj = adj_ref[...]                           # (G, N, N) bf16, row-normalized
        xb3 = x_ref[...]                             # (G, N, F) bf16
        x_f32 = None

        for l in range(n_layers):
            w_s = layer_refs[3 * l][...]             # (F, F) bf16
            w_n = layer_refs[3 * l + 1][...]         # (F, F) bf16
            b = layer_refs[3 * l + 2][...]           # (1, F) f32

            # mean neighbor aggregation, batched over the G graphs in the block
            neigh = jnp.einsum("gnm,gmf->gnf", adj, xb3,
                               preferred_element_type=jnp.float32)   # (G,N,F) f32

            # per-node transforms: big-M (G*N rows) MXU dots, f32 accumulate
            h = (jnp.dot(xb3.reshape(G * N, F), w_s,
                         preferred_element_type=jnp.float32)
                 + jnp.dot(neigh.reshape(G * N, F).astype(jnp.bfloat16), w_n,
                           preferred_element_type=jnp.float32)
                 + b)
            x_f32 = jnp.maximum(h, 0.0)              # ReLU, (G*N, F) f32
            xb3 = x_f32.astype(jnp.bfloat16).reshape(G, N, F)

        # global max-pool over nodes + 2-layer FC head (M = G rows), in-kernel
        pooled = jnp.max(x_f32.reshape(G, N, F), axis=1)             # (G, F) f32
        h1 = jnp.dot(pooled.astype(jnp.bfloat16), w1_ref[...],
                     preferred_element_type=jnp.float32) + b1_ref[...]
        out = jnp.dot(h1.astype(jnp.bfloat16), w2_ref[...],
                      preferred_element_type=jnp.float32) + b2_ref[...]
        o_ref[...] = out.reshape(G, 1, F)            # lane-dense store

    return kernel


# ----------------------------------------------------------------------------
# Wrapper: choose graphs/step, pad & cast streams, launch the fused kernel.
# ----------------------------------------------------------------------------
def _choose_graphs_per_step(B, N):
    # Aim for ~8 graphs per step, keep >= 2 grid steps whenever B >= 2
    # (v7x megacore), and cap so double-buffered bf16 x + adj blocks stay small.
    if B >= 16:
        G = 8
    elif B >= 4:
        G = B // 2
    else:
        G = 1
    blk_bytes = lambda g: 2 * (g * N * FPAD * 2 + g * N * N * 2)
    while G > 1 and blk_bytes(G) > 8 * 1024 * 1024:
        G = max(1, G // 2)
    return G


def graphsage_model_forward(x, adj, params, out_features, graphs_per_step=None):
    B, N, Fin = x.shape
    n_layers = len(params["gconv"])
    G = graphs_per_step or _choose_graphs_per_step(B, N)
    n_steps = -(-B // G)
    B_pad = n_steps * G

    # Row-normalize the adjacency ONCE (exact f32 divide), then bf16 the stream.
    deg = jnp.sum(adj, axis=-1, keepdims=True)
    adj_norm = (adj / jnp.maximum(deg, 1.0)).astype(jnp.bfloat16)

    # Zero-pad activations to 128 lanes and (if needed) pad the batch to G|B_pad.
    x_pad = jnp.zeros((B_pad, N, FPAD), jnp.bfloat16)
    x_pad = x_pad.at[:B, :, :Fin].set(x.astype(jnp.bfloat16))
    adj_pad = jnp.zeros((B_pad, N, N), jnp.bfloat16).at[:B].set(adj_norm)

    # Per-layer weights, zero-padded to (128, 128) (exact: padded rows/cols = 0).
    layer_args = []
    fin = Fin
    for (w_s, w_n, b) in params["gconv"]:
        fout = w_s.shape[1]
        ws_p = jnp.zeros((FPAD, FPAD), jnp.float32).at[:fin, :fout].set(w_s)
        wn_p = jnp.zeros((FPAD, FPAD), jnp.float32).at[:fin, :fout].set(w_n)
        b_p = jnp.zeros((1, FPAD), jnp.float32).at[:, :fout].set(b)
        layer_args += [ws_p.astype(jnp.bfloat16), wn_p.astype(jnp.bfloat16), b_p]
        fin = fout

    w1, b1, w2, b2 = params["fc"]
    f_last, n_hidden = w1.shape
    w1_p = jnp.zeros((FPAD, FPAD), jnp.float32).at[:f_last, :n_hidden].set(w1)
    b1_p = jnp.zeros((1, FPAD), jnp.float32).at[:, :n_hidden].set(b1)
    w2_p = jnp.zeros((FPAD, FPAD), jnp.float32).at[:n_hidden, :out_features].set(w2)
    b2_p = jnp.zeros((1, FPAD), jnp.float32).at[:, :out_features].set(b2)
    w1_p = w1_p.astype(jnp.bfloat16)
    w2_p = w2_p.astype(jnp.bfloat16)

    in_specs = [
        pl.BlockSpec((G, N, FPAD), lambda i: (i, 0, 0)),   # x (bf16)
        pl.BlockSpec((G, N, N), lambda i: (i, 0, 0)),      # normalized adj (bf16)
    ]
    for _ in range(n_layers):
        in_specs += [
            pl.BlockSpec((FPAD, FPAD), lambda i: (0, 0)),  # W_self
            pl.BlockSpec((FPAD, FPAD), lambda i: (0, 0)),  # W_neigh
            pl.BlockSpec((1, FPAD), lambda i: (0, 0)),     # bias
        ]
    in_specs += [
        pl.BlockSpec((FPAD, FPAD), lambda i: (0, 0)),      # w1
        pl.BlockSpec((1, FPAD), lambda i: (0, 0)),         # b1
        pl.BlockSpec((FPAD, FPAD), lambda i: (0, 0)),      # w2
        pl.BlockSpec((1, FPAD), lambda i: (0, 0)),         # b2
    ]

    out_pad = pl.pallas_call(
        _make_fused_kernel(n_layers),
        out_shape=jax.ShapeDtypeStruct((B_pad, 1, FPAD), jnp.float32),
        grid_spec=pltpu.PrefetchScalarGridSpec(
            num_scalar_prefetch=0,
            grid=(n_steps,),
            in_specs=in_specs,
            out_specs=pl.BlockSpec((G, 1, FPAD), lambda i: (i, 0, 0)),
        ),
        compiler_params=pltpu.CompilerParams(
            dimension_semantics=("parallel",)),
    )(x_pad, adj_pad, *layer_args, w1_p, b1_p, w2_p, b2_p)

    return out_pad[:B, 0, :out_features]                   # slice off padding


# ----------------------------------------------------------------------------
# Parameter init (unpadded, PyTorch-Linear-style uniform).
# ----------------------------------------------------------------------------
def init_params(key, in_features, filters, n_hidden, out_features):
    params = {"gconv": [], "fc": None}
    fin = in_features
    for f in filters:
        key, k1, k2, k3 = jax.random.split(key, 4)
        scale = 1.0 / jnp.sqrt(jnp.float32(fin))
        w_self = jax.random.uniform(k1, (fin, f), jnp.float32, -scale, scale)
        w_neigh = jax.random.uniform(k2, (fin, f), jnp.float32, -scale, scale)
        b = jax.random.uniform(k3, (1, f), jnp.float32, -scale, scale)
        params["gconv"].append((w_self, w_neigh, b))
        fin = f
    key, k1, k2, k3, k4 = jax.random.split(key, 5)
    s1 = 1.0 / jnp.sqrt(jnp.float32(filters[-1]))
    w1 = jax.random.uniform(k1, (filters[-1], n_hidden), jnp.float32, -s1, s1)
    b1 = jax.random.uniform(k2, (1, n_hidden), jnp.float32, -s1, s1)
    s2 = 1.0 / jnp.sqrt(jnp.float32(n_hidden))
    w2 = jax.random.uniform(k3, (n_hidden, out_features), jnp.float32, -s2, s2)
    b2 = jax.random.uniform(k4, (1, out_features), jnp.float32, -s2, s2)
    params["fc"] = (w1, b1, w2, b2)
    return params


# Pure-JAX reference (f32, exact mean) for a sanity check.
def _reference_forward(x, adj, params):
    deg = jnp.sum(adj, axis=-1, keepdims=True)
    adj_norm = adj / jnp.maximum(deg, 1.0)
    h = x
    for (w_s, w_n, b) in params["gconv"]:
        neigh = jnp.einsum("bnm,bmf->bnf", adj_norm, h)
        h = jax.nn.relu(h @ w_s + neigh @ w_n + b)
    pooled = jnp.max(h, axis=1)
    w1, b1, w2, b2 = params["fc"]
    return (pooled @ w1 + b1) @ w2 + b2


if __name__ == "__main__":
    # Small shapes consistent with the model: a batch of graphs, N nodes each.
    B, N = 8, 16
    in_features = 8
    filters = [32, 32]          # args.filters
    n_hidden = 32               # args.n_hidden
    out_features = 10

    key = jax.random.PRNGKey(0)
    key, kx, ka = jax.random.split(key, 3)
    x = jax.random.normal(kx, (B, N, in_features), jnp.float32)
    # symmetric 0/1 adjacency with self-loops
    a = (jax.random.uniform(ka, (B, N, N)) > 0.7).astype(jnp.float32)
    adj = jnp.clip(a + jnp.transpose(a, (0, 2, 1)) + jnp.eye(N)[None], 0.0, 1.0)

    params = init_params(key, in_features, filters, n_hidden, out_features)

    out = graphsage_model_forward(x, adj, params, out_features)
    jax.block_until_ready(out)
    assert out.shape == (B, out_features), out.shape

    # Loose tolerance: kernel uses bf16 MXU operands (accumulation in f32).
    ref = _reference_forward(x, adj, params)
    np.testing.assert_allclose(np.asarray(out), np.asarray(ref), atol=0.1, rtol=0.1)

    print("KERNEL_OK")
</pallas_src>

<mosaic_0001>
module attributes {stable_mosaic.version = 11 : i64} {
  func.func @kernel(%arg0: i32, %arg1: memref<4x16x128xbf16, #tpu.memory_space<vmem>>, %arg2: memref<4x16x16xbf16, #tpu.memory_space<vmem>>, %arg3: memref<128x128xbf16, #tpu.memory_space<vmem>>, %arg4: memref<128x128xbf16, #tpu.memory_space<vmem>>, %arg5: memref<1x128xf32, #tpu.memory_space<vmem>>, %arg6: memref<128x128xbf16, #tpu.memory_space<vmem>>, %arg7: memref<128x128xbf16, #tpu.memory_space<vmem>>, %arg8: memref<1x128xf32, #tpu.memory_space<vmem>>, %arg9: memref<128x128xbf16, #tpu.memory_space<vmem>>, %arg10: memref<1x128xf32, #tpu.memory_space<vmem>>, %arg11: memref<128x128xbf16, #tpu.memory_space<vmem>>, %arg12: memref<1x128xf32, #tpu.memory_space<vmem>>, %arg13: memref<4x1x128xf32, #tpu.memory_space<vmem>>) attributes {dimension_semantics = [#tpu.dimension_semantics<parallel>], iteration_bounds = array<i64: 2>, scalar_prefetch = 0 : i64, scratch_operands = 0 : i64, tpu.core_type = #tpu.core_type<tc>, window_params = [{transform_indices = @transform_0, window_bounds = array<i64: 4, 16, 128>}, {transform_indices = @transform_1, window_bounds = array<i64: 4, 16, 16>}, {pipeline_mode = #tpu.pipeline_mode<synchronous>, transform_indices = @transform_2, window_bounds = array<i64: 128, 128>}, {pipeline_mode = #tpu.pipeline_mode<synchronous>, transform_indices = @transform_3, window_bounds = array<i64: 128, 128>}, {pipeline_mode = #tpu.pipeline_mode<synchronous>, transform_indices = @transform_4, window_bounds = array<i64: 1, 128>}, {pipeline_mode = #tpu.pipeline_mode<synchronous>, transform_indices = @transform_5, window_bounds = array<i64: 128, 128>}, {pipeline_mode = #tpu.pipeline_mode<synchronous>, transform_indices = @transform_6, window_bounds = array<i64: 128, 128>}, {pipeline_mode = #tpu.pipeline_mode<synchronous>, transform_indices = @transform_7, window_bounds = array<i64: 1, 128>}, {pipeline_mode = #tpu.pipeline_mode<synchronous>, transform_indices = @transform_8, window_bounds = array<i64: 128, 128>}, {pipeline_mode = #tpu.pipeline_mode<synchronous>, transform_indices = @transform_9, window_bounds = array<i64: 1, 128>}, {pipeline_mode = #tpu.pipeline_mode<synchronous>, transform_indices = @transform_10, window_bounds = array<i64: 128, 128>}, {pipeline_mode = #tpu.pipeline_mode<synchronous>, transform_indices = @transform_11, window_bounds = array<i64: 1, 128>}, {transform_indices = @transform_12, window_bounds = array<i64: 4, 1, 128>}]} {
    %c0 = arith.constant 0 : index
    %c0_0 = arith.constant 0 : index
    %c0_1 = arith.constant 0 : index
    %0 = vector.load %arg2[%c0, %c0_0, %c0_1] : memref<4x16x16xbf16, #tpu.memory_space<vmem>>, vector<4x16x16xbf16>
    %c0_2 = arith.constant 0 : index
    %c0_3 = arith.constant 0 : index
    %c0_4 = arith.constant 0 : index
    %1 = vector.load %arg1[%c0_2, %c0_3, %c0_4] : memref<4x16x128xbf16, #tpu.memory_space<vmem>>, vector<4x16x128xbf16>
    %c0_5 = arith.constant 0 : index
    %c0_6 = arith.constant 0 : index
    %2 = vector.load %arg3[%c0_5, %c0_6] : memref<128x128xbf16, #tpu.memory_space<vmem>>, vector<128x128xbf16>
    %c0_7 = arith.constant 0 : index
    %c0_8 = arith.constant 0 : index
    %3 = vector.load %arg4[%c0_7, %c0_8] : memref<128x128xbf16, #tpu.memory_space<vmem>>, vector<128x128xbf16>
    %c0_9 = arith.constant 0 : index
    %c0_10 = arith.constant 0 : index
    %4 = vector.load %arg5[%c0_9, %c0_10] : memref<1x128xf32, #tpu.memory_space<vmem>>, vector<1x128xf32>
    "tpu.trace_start"() <{level = 10 : i32, message = "gnm,gmf->gnf"}> : () -> ()
    %cst = arith.constant dense<0.000000e+00> : vector<4x16x128xf32>
    %5 = tpu.matmul %0, %1, %cst {dimension_numbers = #tpu.dot_dimension_numbers<[2], [1], [1], [2], [0, 0, 0, 1, 1, 2], [0], [0]>} : vector<4x16x16xbf16>, vector<4x16x128xbf16>, vector<4x16x128xf32> -> vector<4x16x128xf32>
    "tpu.trace_stop"() : () -> ()
    %6 = vector.shape_cast %1 : vector<4x16x128xbf16> to vector<64x128xbf16>
    %cst_11 = arith.constant dense<0.000000e+00> : vector<64x128xf32>
    %7 = tpu.matmul %6, %2, %cst_11 {dimension_numbers = #tpu.dot_dimension_numbers<[1], [0], [0], [1], [0, 0, 1, 1], [], []>} : vector<64x128xbf16>, vector<128x128xbf16>, vector<64x128xf32> -> vector<64x128xf32>
    %8 = vector.shape_cast %5 : vector<4x16x128xf32> to vector<64x128xf32>
    %9 = arith.truncf %8 : vector<64x128xf32> to vector<64x128xbf16>
    %cst_12 = arith.constant dense<0.000000e+00> : vector<64x128xf32>
    %10 = tpu.matmul %9, %3, %cst_12 {dimension_numbers = #tpu.dot_dimension_numbers<[1], [0], [0], [1], [0, 0, 1, 1], [], []>} : vector<64x128xbf16>, vector<128x128xbf16>, vector<64x128xf32> -> vector<64x128xf32>
    %11 = arith.addf %7, %10 : vector<64x128xf32>
    %12 = vector.broadcast %4 : vector<1x128xf32> to vector<64x128xf32>
    %13 = arith.addf %11, %12 : vector<64x128xf32>
    %cst_13 = arith.constant 0.000000e+00 : f32
    %14 = vector.broadcast %cst_13 : f32 to vector<64x128xf32>
    %15 = arith.maximumf %13, %14 : vector<64x128xf32>
    %16 = arith.truncf %15 : vector<64x128xf32> to vector<64x128xbf16>
    %17 = vector.shape_cast %16 : vector<64x128xbf16> to vector<4x16x128xbf16>
    %c0_14 = arith.constant 0 : index
    %c0_15 = arith.constant 0 : index
    %18 = vector.load %arg6[%c0_14, %c0_15] : memref<128x128xbf16, #tpu.memory_space<vmem>>, vector<128x128xbf16>
    %c0_16 = arith.constant 0 : index
    %c0_17 = arith.constant 0 : index
    %19 = vector.load %arg7[%c0_16, %c0_17] : memref<128x128xbf16, #tpu.memory_space<vmem>>, vector<128x128xbf16>
    %c0_18 = arith.constant 0 : index
    %c0_19 = arith.constant 0 : index
    %20 = vector.load %arg8[%c0_18, %c0_19] : memref<1x128xf32, #tpu.memory_space<vmem>>, vector<1x128xf32>
    "tpu.trace_start"() <{level = 10 : i32, message = "gnm,gmf->gnf"}> : () -> ()
    %cst_20 = arith.constant dense<0.000000e+00> : vector<4x16x128xf32>
    %21 = tpu.matmul %0, %17, %cst_20 {dimension_numbers = #tpu.dot_dimension_numbers<[2], [1], [1], [2], [0, 0, 0, 1, 1, 2], [0], [0]>} : vector<4x16x16xbf16>, vector<4x16x128xbf16>, vector<4x16x128xf32> -> vector<4x16x128xf32>
    "tpu.trace_stop"() : () -> ()
    %22 = vector.shape_cast %17 : vector<4x16x128xbf16> to vector<64x128xbf16>
    %cst_21 = arith.constant dense<0.000000e+00> : vector<64x128xf32>
    %23 = tpu.matmul %22, %18, %cst_21 {dimension_numbers = #tpu.dot_dimension_numbers<[1], [0], [0], [1], [0, 0, 1, 1], [], []>} : vector<64x128xbf16>, vector<128x128xbf16>, vector<64x128xf32> -> vector<64x128xf32>
    %24 = vector.shape_cast %21 : vector<4x16x128xf32> to vector<64x128xf32>
    %25 = arith.truncf %24 : vector<64x128xf32> to vector<64x128xbf16>
    %cst_22 = arith.constant dense<0.000000e+00> : vector<64x128xf32>
    %26 = tpu.matmul %25, %19, %cst_22 {dimension_numbers = #tpu.dot_dimension_numbers<[1], [0], [0], [1], [0, 0, 1, 1], [], []>} : vector<64x128xbf16>, vector<128x128xbf16>, vector<64x128xf32> -> vector<64x128xf32>
    %27 = arith.addf %23, %26 : vector<64x128xf32>
    %28 = vector.broadcast %20 : vector<1x128xf32> to vector<64x128xf32>
    %29 = arith.addf %27, %28 : vector<64x128xf32>
    %cst_23 = arith.constant 0.000000e+00 : f32
    %30 = vector.broadcast %cst_23 : f32 to vector<64x128xf32>
    %31 = arith.maximumf %29, %30 : vector<64x128xf32>
    %32 = vector.shape_cast %31 : vector<64x128xf32> to vector<4x16x128xf32>
    %cst_24 = arith.constant dense<0xFF800000> : vector<4x128xf32>
    %33 = vector.multi_reduction <maximumf>, %32, %cst_24 [1] : vector<4x16x128xf32> to vector<4x128xf32>
    %34 = arith.truncf %33 : vector<4x128xf32> to vector<4x128xbf16>
    %c0_25 = arith.constant 0 : index
    %c0_26 = arith.constant 0 : index
    %35 = vector.load %arg9[%c0_25, %c0_26] : memref<128x128xbf16, #tpu.memory_space<vmem>>, vector<128x128xbf16>
    %cst_27 = arith.constant dense<0.000000e+00> : vector<4x128xf32>
    %36 = tpu.matmul %34, %35, %cst_27 {dimension_numbers = #tpu.dot_dimension_numbers<[1], [0], [0], [1], [0, 0, 1, 1], [], []>} : vector<4x128xbf16>, vector<128x128xbf16>, vector<4x128xf32> -> vector<4x128xf32>
    %c0_28 = arith.constant 0 : index
    %c0_29 = arith.constant 0 : index
    %37 = vector.load %arg10[%c0_28, %c0_29] : memref<1x128xf32, #tpu.memory_space<vmem>>, vector<1x128xf32>
    %38 = vector.broadcast %37 : vector<1x128xf32> to vector<4x128xf32>
    %39 = arith.addf %36, %38 : vector<4x128xf32>
    %40 = arith.truncf %39 : vector<4x128xf32> to vector<4x128xbf16>
    %c0_30 = arith.constant 0 : index
    %c0_31 = arith.constant 0 : index
    %41 = vector.load %arg11[%c0_30, %c0_31] : memref<128x128xbf16, #tpu.memory_space<vmem>>, vector<128x128xbf16>
    %cst_32 = arith.constant dense<0.000000e+00> : vector<4x128xf32>
    %42 = tpu.matmul %40, %41, %cst_32 {dimension_numbers = #tpu.dot_dimension_numbers<[1], [0], [0], [1], [0, 0, 1, 1], [], []>} : vector<4x128xbf16>, vector<128x128xbf16>, vector<4x128xf32> -> vector<4x128xf32>
    %c0_33 = arith.constant 0 : index
    %c0_34 = arith.constant 0 : index
    %43 = vector.load %arg12[%c0_33, %c0_34] : memref<1x128xf32, #tpu.memory_space<vmem>>, vector<1x128xf32>
    %44 = vector.broadcast %43 : vector<1x128xf32> to vector<4x128xf32>
    %45 = arith.addf %42, %44 : vector<4x128xf32>
    %46 = vector.shape_cast %45 : vector<4x128xf32> to vector<4x1x128xf32>
    %c0_35 = arith.constant 0 : index
    %c0_36 = arith.constant 0 : index
    %c0_37 = arith.constant 0 : index
    %47 = vector.load %arg13[%c0_35, %c0_36, %c0_37] : memref<4x1x128xf32, #tpu.memory_space<vmem>>, vector<4x1x128xf32>
    tpu.vector_store %arg13[%c0_35, %c0_36, %c0_37], %46 {strides = array<i32>} : memref<4x1x128xf32, #tpu.memory_space<vmem>>, vector<4x1x128xf32>,
    return
  }
  func.func @transform_0(%arg0: i32) -> (i32, i32, i32) {
    %c0_i32 = arith.constant 0 : i32
    %c0_i32_0 = arith.constant 0 : i32
    %c0_i32_1 = arith.constant 0 : i32
    return %arg0, %c0_i32, %c0_i32_0 : i32, i32, i32
  }
  func.func @transform_1(%arg0: i32) -> (i32, i32, i32) {
    %c0_i32 = arith.constant 0 : i32
    %c0_i32_0 = arith.constant 0 : i32
    %c0_i32_1 = arith.constant 0 : i32
    return %arg0, %c0_i32, %c0_i32_0 : i32, i32, i32
  }
  func.func @transform_2(%arg0: i32) -> (i32, i32) {
    %c0_i32 = arith.constant 0 : i32
    %c0_i32_0 = arith.constant 0 : i32
    %c0_i32_1 = arith.constant 0 : i32
    return %c0_i32, %c0_i32_0 : i32, i32
  }
  func.func @transform_3(%arg0: i32) -> (i32, i32) {
    %c0_i32 = arith.constant 0 : i32
    %c0_i32_0 = arith.constant 0 : i32
    %c0_i32_1 = arith.constant 0 : i32
    return %c0_i32, %c0_i32_0 : i32, i32
  }
  func.func @transform_4(%arg0: i32) -> (i32, i32) {
    %c0_i32 = arith.constant 0 : i32
    %c0_i32_0 = arith.constant 0 : i32
    %c0_i32_1 = arith.constant 0 : i32
    return %c0_i32, %c0_i32_0 : i32, i32
  }
  func.func @transform_5(%arg0: i32) -> (i32, i32) {
    %c0_i32 = arith.constant 0 : i32
    %c0_i32_0 = arith.constant 0 : i32
    %c0_i32_1 = arith.constant 0 : i32
    return %c0_i32, %c0_i32_0 : i32, i32
  }
  func.func @transform_6(%arg0: i32) -> (i32, i32) {
    %c0_i32 = arith.constant 0 : i32
    %c0_i32_0 = arith.constant 0 : i32
    %c0_i32_1 = arith.constant 0 : i32
    return %c0_i32, %c0_i32_0 : i32, i32
  }
  func.func @transform_7(%arg0: i32) -> (i32, i32) {
    %c0_i32 = arith.constant 0 : i32
    %c0_i32_0 = arith.constant 0 : i32
    %c0_i32_1 = arith.constant 0 : i32
    return %c0_i32, %c0_i32_0 : i32, i32
  }
  func.func @transform_8(%arg0: i32) -> (i32, i32) {
    %c0_i32 = arith.constant 0 : i32
    %c0_i32_0 = arith.constant 0 : i32
    %c0_i32_1 = arith.constant 0 : i32
    return %c0_i32, %c0_i32_0 : i32, i32
  }
  func.func @transform_9(%arg0: i32) -> (i32, i32) {
    %c0_i32 = arith.constant 0 : i32
    %c0_i32_0 = arith.constant 0 : i32
    %c0_i32_1 = arith.constant 0 : i32
    return %c0_i32, %c0_i32_0 : i32, i32
  }
  func.func @transform_10(%arg0: i32) -> (i32, i32) {
    %c0_i32 = arith.constant 0 : i32
    %c0_i32_0 = arith.constant 0 : i32
    %c0_i32_1 = arith.constant 0 : i32
    return %c0_i32, %c0_i32_0 : i32, i32
  }
  func.func @transform_11(%arg0: i32) -> (i32, i32) {
    %c0_i32 = arith.constant 0 : i32
    %c0_i32_0 = arith.constant 0 : i32
    %c0_i32_1 = arith.constant 0 : i32
    return %c0_i32, %c0_i32_0 : i32, i32
  }
  func.func @transform_12(%arg0: i32) -> (i32, i32, i32) {
    %c0_i32 = arith.constant 0 : i32
    %c0_i32_0 = arith.constant 0 : i32
    %c0_i32_1 = arith.constant 0 : i32
    return %arg0, %c0_i32, %c0_i32_0 : i32, i32, i32
  }
}

</mosaic_0001>

<bundles_post_ra>
// kernel: tpu_custom_call.1
= control target key start
LH: loop header
LB: loop body
LE: loop exit
PB: predicated region body
PF: predicated region fallthrough
CT: control target
= control target key end

     0   :  { %s3355_s0 = inlined_call_operand.hbm [shape: bf16[8,16,128], index: 0, kind: input, shape index: {}]   ;;  %s3356_s1 = inlined_call_operand.hbm [shape: bf16[8,16,16], index: 1, kind: input, shape index: {}]   ;;  %s3357_s2 = inlined_call_operand.hbm [shape: bf16[128,128], index: 2, kind: input, shape index: {}]   ;;  %s3358_s3 = inlined_call_operand.hbm [shape: bf16[128,128], index: 3, kind: input, shape index: {}]   ;;  %s3359_s4 = inlined_call_operand.vmem [shape: f32[1,128], index: 4, kind: input, shape index: {}]   ;;  %s3360_s5 = inlined_call_operand.hbm [shape: bf16[128,128], index: 5, kind: input, shape index: {}]   ;;  %s3361_s6 = inlined_call_operand.hbm [shape: bf16[128,128], index: 6, kind: input, shape index: {}]   ;;  %s3362_s7 = inlined_call_operand.vmem [shape: f32[1,128], index: 7, kind: input, shape index: {}]   ;;  %s3363_s8 = inlined_call_operand.hbm [shape: bf16[128,128], index: 8, kind: input, shape index: {}]   ;;  %s3364_s9 = inlined_call_operand.vmem [shape: f32[1,128], index: 9, kind: input, shape index: {}]   ;;  %s3365_s10 = inlined_call_operand.hbm [shape: bf16[128,128], index: 10, kind: input, shape index: {}]   ;;  %s3366_s11 = inlined_call_operand.vmem [shape: f32[1,128], index: 11, kind: input, shape index: {}]   ;;  %s3367_s12 = inlined_call_operand.hbm [shape: f32[8,1,128], index: 12, kind: output, shape index: {}]  }
   0x1   :  { %3376 = sst [smem:[#allocation26_spill]] %s3355_s0 }
   0x2   :  { %3377 = sst [smem:[#allocation27_spill]] %s3357_s2 }
   0x3   :  { %3378 = sst [smem:[#allocation28_spill]] %s3358_s3 }
   0x4   :  { %3379 = sst [smem:[#allocation29_spill]] %s3360_s5 }
   0x5   :  { %3380 = sst [smem:[#allocation30_spill]] %s3361_s6 }
   0x6   :  { %3381 = sst [smem:[#allocation31_spill]] %s3363_s8 }
   0x7   :  { %3382 = sst [smem:[#allocation32_spill]] %s3365_s10 }
   0x8   :  { %17 = vsyncpa [#allocation3], 0 }
   0x9   :  { %19 = vsyncpa [#allocation3 + $0x1], 0 }
   0xa   :  { %20 = vsyncpa [#allocation6], 0 }
   0xb   :  { %22 = vsyncpa [#allocation6 + $0x1], 0 }
   0xc   :  { %23 = vsyncpa [#allocation9], 0 }
   0xd   :  { %24 = vsyncpa [#allocation12], 0 }
   0xe   :  { %25 = vsyncpa [#allocation15], 0 }
   0xf   :  { %26 = vsyncpa [#allocation4], 0 }
  0x10   :  { %28 = vsyncpa [#allocation4 + $0x1], 0  ;;  %s2938_s21 = smov 0   ;;  %s2940_s22 = smov 0  }
  0x11   :  { %s2942_s23 = smov 0   ;;  %s2944_s24 = smov 0  }
  0x12 LB: > { %3383 = sst [smem:[#allocation24_spill]] %s2851_s23  ;;  %s2857_s25 = smov [#allocation7]   ;;  %s2855_s24 = sphi %s2944_s24, %s3419_s24   ;;  %s2851_s23 = sphi %s2942_s23, %s3418_s23   ;;  %s2847_s22 = sphi %s2940_s22, %s3417_s22   ;;  %s2843_s21 = sphi %s2938_s21, %s3416_s21  }
  0x13   : > { %s339_s26 = sshll.u32 %s2857_s25, 4  ;;  %s2959_s27 = sadd.s32 4294967295, %s2855_s24   ;;  %s340_s26 = int_to_ptr.vmem [resolvable:$true] %s339_s26 }
  0x14   : > { %p2012_p0 = scmp.ge.s32.totalorder %s2855_s24, 1  ;;  %p3373_p1 = scmp.eq.s32.totalorder %s2959_s27, 0 }
  0x15   : > { %p327_p2 = scmp.lt.s32.totalorder %s2855_s24, 3  ;;  %s2858_s29 = smov [#allocation8]  }
  0x16   : > { %s352_s30 = sshll.u32 %s2858_s29, 4  ;;  %s2859_s14 = smov [#allocation11]   ;;  %s2977_s30 = int_to_ptr.vmem [resolvable:$true] %s352_s30 }
  0x17   : > { %p2964_p3 = pnand %p2012_p0, %p327_p2  ;;  %s381_s15 = sshll.u32 %s2859_s14, 4  ;;  %s2979_s15 = int_to_ptr.vmem [resolvable:$true] %s381_s15 }
  0x18   : > { %s2570_s17 = scalar_lea.vmem %s340_s26, 1024  ;;  %p2578_p11 = scmp.lt.s32.totalorder %s340_s26, %s340_s26 }
  0x19   : > { %p2414_p5 = pneg %p2964_p3  ;;  %p2571_p8 = scmp.ne.s32.totalorder %s340_s26, %s2570_s17 }
  0x1a   : > { %p2579_p12 = scmp.lt.s32.totalorder %s2570_s17, %s2570_s17 }
  0x1b   : > { %p2973_p6 = pnand %p2414_p5, %p3373_p1 }
  0x1c   : > { %p2580_p13 = por %p2579_p12, %p2578_p11 }
  0x1d   : > { %p2983_p7 = pneg %p2973_p6 }
  0x1f   : > { %p2573_p9 = pnand %p2571_p8, %p2983_p7 }
  0x21   : > { %p2574_p10 = pneg %p2573_p9 }
  0x23   : > { %p2581_p0 = pnand %p2580_p13, %p2574_p10 }
  0x25   : > { %2584 = shalt.err (!%p2581_p0)
}
  0x26   : > { %s3368_s18 = smov 64   ;;  %s3370_s19 = smov 4  }
  0x27   : > { %s3387_s2 = sld [smem:[#allocation27_spill]]  ;;  %s2596_s29 = scalar_lea.vmem %s2977_s30, 1024 }
  0x28   : > { %p2597_p2 = scmp.ne.s32.totalorder %s2977_s30, %s2596_s29  ;;  %p2604_p9 = scmp.lt.s32.totalorder %s2977_s30, %s2977_s30 }
  0x29   : > { %p2605_p10 = scmp.lt.s32.totalorder %s2596_s29, %s2596_s29 }
  0x2a   : > { %p2599_p5 = pnand %p2597_p2, %p2983_p7 }
  0x2b   : > { %p2606_p11 = por %p2605_p10, %p2604_p9 }
  0x2c   : > { %p2600_p8 = pneg %p2599_p5 }
  0x2d   : > { %2417 = dma.hbm_to_vmem [thread:$0]  (!%p2973_p6), %s3387_s2, 1024, %s340_s26, [#allocation6], %s3368_s18, %s3368_s18, %s3370_s19  }
  0x2e   : > { %p2607_p12 = pnand %p2606_p11, %p2600_p8 }
  0x30   : > { %2610 = shalt.err (!%p2607_p12)
}
  0x31   : > { %s3388_s3 = sld [smem:[#allocation28_spill]]  ;;  %s2622_s26 = scalar_lea.vmem %s2979_s15, 1024 }
  0x32   : > { %p2623_p13 = scmp.ne.s32.totalorder %s2979_s15, %s2622_s26  ;;  %p2630_p5 = scmp.lt.s32.totalorder %s2979_s15, %s2979_s15 }
  0x33   : > { %p2631_p8 = scmp.lt.s32.totalorder %s2622_s26, %s2622_s26 }
  0x34   : > { %p2625_p0 = pnand %p2623_p13, %p2983_p7 }
  0x35   : > { %p2632_p9 = por %p2631_p8, %p2630_p5 }
  0x36   : > { %p2626_p2 = pneg %p2625_p0 }
  0x37   : > { %2420 = dma.hbm_to_vmem [thread:$0]  (!%p2973_p6), %s3388_s3, 1024, %s2977_s30, [#allocation9], %s3368_s18, %s3368_s18, %s3370_s19  }
  0x38   : > { %p2633_p10 = pnand %p2632_p9, %p2626_p2 }
  0x3a   : > { %2636 = shalt.err (!%p2633_p10)
}
  0x3b   : > { %s3389_s6 = sld [smem:[#allocation30_spill]]  ;;  %s2862_s30 = smov [#allocation10]  }
  0x3c   : > { %s368_s29 = sshll.u32 %s2862_s30, 4  ;;  %s2863_s14 = smov [#allocation13]   ;;  %s369_s29 = int_to_ptr.vmem [resolvable:$true] %s368_s29 }
  0x3d   : > { %s397_s17 = sshll.u32 %s2863_s14, 4  ;;  %s2648_s26 = scalar_lea.vmem %s369_s29, 1024  ;;  %s398_s17 = int_to_ptr.vmem [resolvable:$true] %s397_s17 }
  0x3e   : > { %p2649_p11 = scmp.ne.s32.totalorder %s369_s29, %s2648_s26  ;;  %p2656_p0 = scmp.lt.s32.totalorder %s369_s29, %s369_s29 }
  0x3f   : > { %p2657_p2 = scmp.lt.s32.totalorder %s2648_s26, %s2648_s26 }
  0x40   : > { %p2651_p12 = pnand %p2649_p11, %p2983_p7 }
  0x41   : > { %2426 = dma.hbm_to_vmem [thread:$0]  (!%p2973_p6), %s3389_s6, 1024, %s2979_s15, [#allocation12], %s3368_s18, %s3368_s18, %s3370_s19  }
  0x42   : > { %p2652_p13 = pneg %p2651_p12  ;;  %p2658_p5 = por %p2657_p2, %p2656_p0 }
  0x44   : > { %p2659_p8 = pnand %p2658_p5, %p2652_p13 }
  0x46   : > { %2662 = shalt.err (!%p2659_p8)
}
  0x47   : > { %s3390_s5 = sld [smem:[#allocation29_spill]]  ;;  %s2674_s25 = scalar_lea.vmem %s398_s17, 1024 }
  0x48   : > { %p2675_p9 = scmp.ne.s32.totalorder %s398_s17, %s2674_s25  ;;  %p2682_p12 = scmp.lt.s32.totalorder %s398_s17, %s398_s17 }
  0x49   : > { %p2683_p0 = scmp.lt.s32.totalorder %s2674_s25, %s2674_s25 }
  0x4a   : > { %p2677_p10 = pnand %p2675_p9, %p2983_p7 }
  0x4b   : > { %p2684_p13 = por %p2683_p0, %p2682_p12 }
  0x4c   : > { %p2678_p11 = pneg %p2677_p10 }
  0x4d   : > { %2423 = dma.hbm_to_vmem [thread:$0]  (!%p2973_p6), %s3390_s5, 1024, %s369_s29, [#allocation9], %s3368_s18, %s3368_s18, %s3370_s19  }
  0x4e   : > { %p2685_p2 = pnand %p2684_p13, %p2678_p11 }
  0x50   : > { %2688 = shalt.err (!%p2685_p2)
}
  0x51   : > { %s3391_s8 = sld [smem:[#allocation31_spill]]  ;;  %s2864_s29 = smov [#allocation14]  }
  0x52   : > { %s413_s26 = sshll.u32 %s2864_s29, 4  ;;  %s414_s26 = int_to_ptr.vmem [resolvable:$true] %s413_s26 }
  0x53   : > { %s2700_s15 = scalar_lea.vmem %s414_s26, 1024  ;;  %p2708_p10 = scmp.lt.s32.totalorder %s414_s26, %s414_s26 }
  0x54   : > { %p2701_p5 = scmp.ne.s32.totalorder %s414_s26, %s2700_s15  ;;  %p2709_p11 = scmp.lt.s32.totalorder %s2700_s15, %s2700_s15 }
  0x56   : > { %p2703_p8 = pnand %p2701_p5, %p2983_p7  ;;  %p2710_p12 = por %p2709_p11, %p2708_p10 }
  0x57   : > { %2429 = dma.hbm_to_vmem [thread:$0]  (!%p2973_p6), %s3391_s8, 1024, %s398_s17, [#allocation12], %s3368_s18, %s3368_s18, %s3370_s19  }
  0x58   : > { %p2704_p9 = pneg %p2703_p8 }
  0x5a   : > { %p2711_p0 = pnand %p2710_p12, %p2704_p9 }
  0x5c   : > { %2714 = shalt.err (!%p2711_p0)
}
  0x5d   : > { %s3392_s10 = sld [smem:[#allocation32_spill]]  ;;  %s2011_s13 = sadd.s32 4294967294, %s2855_s24  }
  0x5e   : > { %s3059_s16 = sadd.s32 1, %s2855_s24   ;;  %s41_s30 = sadd.s32 1, %s2851_s23 }
  0x5f   : > { %s38_s25 = ssub.s32 %s2855_s24, %s3059_s16  ;;  %p48_p13 = scmp.ne.s32.totalorder %s2851_s23, %s2847_s22 }
  0x60   : > { %p39_p7 = scmp.eq.s32.totalorder %s38_s25, 0  ;;  %p49_p2 = scmp.eq.s32.totalorder %s2855_s24, 0 }
  0x61   : > { %p54_p5 = scmp.ne.s32.totalorder %s2847_s22, %s2843_s21  ;;  %p314_p9 = scmp.eq.s32.totalorder %s2959_s27, 1 }
  0x62   : > { %s3070_s14 = scalar_select %p39_p7, %s2851_s23, %s41_s30  }
  0x63   : > { %2432 = dma.hbm_to_vmem [thread:$0]  (!%p2973_p6), %s3392_s10, 1024, %s414_s26, [#allocation15], %s3368_s18, %s3368_s18, %s3370_s19  }
  0x64   : > { %3393 = sst [smem:[#allocation25_spill]] %s3070_s14  ;;  %p3072_p8 = por %p49_p2, %p48_p13 }
  0x65   : > { %p3078_p6 = por %p3373_p1, %p54_p5  ;;  %p320_p10 = scmp.eq.s32.totalorder %s2011_s13, 1 }
  0x66   : > { %p2450_p11 = scmp.lt.s32.totalorder %s2855_s24, 2  ;;  %s430_s15 = sand.u32 1, %s2851_s23  }
  0x67   : > { %s3395_s26 = scalar_select %p3078_p6, 1, 0 }
  0x68   : > { %p3085_p12 = por %p314_p9, %p48_p13  ;;  %p3089_p0 = por %p320_p10, %p54_p5 }
  0x69   : > { %s2020_s25 = sshll.u32 %s430_s15, 5  ;;  %s2114_s30 = sshll.u32 %s2855_s24, 9 }
  0x6a   : > { %s3396_s20 = scalar_select %p3085_p12, 1, 0 }
  0x6b   : > { %s3397_s17 = scalar_select %p3089_p0, 1, 0 }
  0x6c   : > { %s3398_s0 = sld [smem:[#allocation26_spill]]  ;;  %s434_s13 = scalar_lea.vmem [#allocation2], %s2020_s25 }
  0x6d   : > { %s442_s3 = sshll.u32 %s434_s13, 4  ;;  %p3103_p7 = pnand %p2450_p11, %p3072_p8  ;;  %s3099_s3 = int_to_ptr.vmem [resolvable:$true] %s442_s3 }
  0x6e   : > { %s3110_s18 = scalar_lea.hbm %s3356_s1, %s2114_s30  ;;  %s456_s19 = scalar_lea.vmem [#allocation5], %s2020_s25 }
  0x6f   : > { %s3112_s10 = sshll.u32 %s456_s19, 4  ;;  %s3114_s14 = scalar_lea.sflag [#allocation3], %s430_s15  ;;  %s3145_s10 = int_to_ptr.vmem [resolvable:$true] %s3112_s10 }
  0x70   : > { %p2717_p2 = pneg %p3103_p7 }
  0x72   : > { %s3097_s2 = scalar_lea.hbm %s3398_s0, %s2114_s30  ;;  %s2720_s6 = scalar_lea.hbm %s3398_s0, 1024 }
  0x73   : > { %s2715_s13 = scalar_lea.hbm %s3097_s2, 512  ;;  %p2721_p9 = scmp.lt.s32.totalorder %s3097_s2, %s3398_s0 }
  0x74   : > { %p2716_p13 = scmp.ne.s32.totalorder %s3097_s2, %s2715_s13  ;;  %p2722_p10 = scmp.lt.s32.totalorder %s2720_s6, %s2715_s13 }
  0x76   : > { %p2718_p5 = pnand %p2717_p2, %p2716_p13  ;;  %p2723_p11 = por %p2722_p10, %p2721_p9 }
  0x78   : > { %p2719_p8 = pneg %p2718_p5 }
  0x7a   : > { %p2724_p4 = pnand %p2723_p11, %p2719_p8 }
  0x7c   : > { %2727 = shalt.err (!%p2724_p4)
}
  0x7d   : > { %s2728_s15 = scalar_lea.vmem %s3099_s3, 512  ;;  %s2865_s23 = smov [#allocation2]  }
  0x7e   : > { %p2729_p1 = scmp.ne.s32.totalorder %s3099_s3, %s2728_s15  ;;  %s2733_s25 = sshll.u32 %s2865_s23, 4  ;;  %s2734_s25 = int_to_ptr.vmem [resolvable:$false] %s2733_s25 }
  0x7f   : > { %s2735_s19 = scalar_lea.vmem %s2734_s25, 1024  ;;  %p2736_p0 = scmp.lt.s32.totalorder %s3099_s3, %s2734_s25 }
  0x80   : > { %p2731_p13 = pnand %p2729_p1, %p2717_p2  ;;  %p2737_p12 = scmp.lt.s32.totalorder %s2735_s19, %s2728_s15 }
  0x82   : > { %p2732_p5 = pneg %p2731_p13  ;;  %p2738_p6 = por %p2737_p12, %p2736_p0 }
  0x84   : > { %p2739_p9 = pnand %p2738_p6, %p2732_p5 }
  0x86   : > { %2742 = shalt.err (!%p2739_p9)
}
  0x87   : > { %s3400_s13 = smov 4   ;;  %s3401_s29 = smov 64  }
  0x88   : > { %2436 = dma.hbm_to_vmem [thread:$0]  (!%p3103_p7), %s3097_s2, 512, %s3099_s3, %s3114_s14, %s3401_s29, %s3401_s29, %s3400_s13  }
  0x89   : > { %s452_s6 = sand.u32 1, %s2855_s24   ;;  %s2743_s30 = scalar_lea.hbm %s3110_s18, 512 }
  0x8a   : > { %s453_s8 = scalar_lea.sflag [#allocation6], %s452_s6  ;;  %p2744_p1 = scmp.ne.s32.totalorder %s3110_s18, %s2743_s30 }
  0x8b   : > { %s2748_s25 = scalar_lea.hbm %s3356_s1, 1024  ;;  %p2749_p12 = scmp.lt.s32.totalorder %s3110_s18, %s3356_s1 }
  0x8c   : > { %p2746_p4 = pnand %p2744_p1, %p2717_p2  ;;  %p2750_p0 = scmp.lt.s32.totalorder %s2748_s25, %s2743_s30 }
  0x8e   : > { %p2747_p6 = pneg %p2746_p4  ;;  %p2751_p8 = por %p2750_p0, %p2749_p12 }
  0x90   : > { %p2752_p10 = pnand %p2751_p8, %p2747_p6 }
  0x92   : > { %2755 = shalt.err (!%p2752_p10)
}
  0x93   : > { %s2756_s2 = scalar_lea.vmem %s3145_s10, 512  ;;  %s2866_s3 = smov [#allocation5]  }
  0x94   : > { %p2757_p11 = scmp.ne.s32.totalorder %s3145_s10, %s2756_s2  ;;  %s2761_s14 = sshll.u32 %s2866_s3, 4  ;;  %s2762_s14 = int_to_ptr.vmem [resolvable:$false] %s2761_s14 }
  0x95   : > { %s2763_s6 = scalar_lea.vmem %s2762_s14, 1024  ;;  %p2764_p9 = scmp.lt.s32.totalorder %s3145_s10, %s2762_s14 }
  0x96   : > { %p2759_p13 = pnand %p2757_p11, %p2717_p2  ;;  %p2765_p1 = scmp.lt.s32.totalorder %s2763_s6, %s2756_s2 }
  0x98   : > { %p2760_p5 = pneg %p2759_p13  ;;  %p2766_p4 = por %p2765_p1, %p2764_p9 }
  0x9a   : > { %p2767_p12 = pnand %p2766_p4, %p2760_p5 }
  0x9c   : > { %2770 = shalt.err (!%p2767_p12)
}
  0x9d   : > { %2439 = dma.hbm_to_vmem [thread:$0]  (!%p3103_p7), %s3110_s18, 512, %s3145_s10, %s453_s8, %s3401_s29, %s3401_s29, %s3400_s13  }
  0x9e   : > { %476 = sbr.rel (%p2964_p3) target bundleno = 1445 (0x5a5), region = 68  ;;  %s3176_s0 = sand.u32 (!%p2964_p3), 1, %s2847_s22  }
  0x9f   : > { %s2029_s30 = sshll.u32 (!%p2964_p3), %s3176_s0, 5  ;;  %s479_s15 = scalar_lea.sflag (!%p2964_p3), [#allocation3], %s3176_s0 }
  0xa0   : > { %s3180_s23 = scalar_lea.vmem (!%p2964_p3), [#allocation2], %s2029_s30  ;;  %p3402_p2 = scmp.ne.s32.totalorder (!%p2964_p3), %s3395_s26, 0 }
  0xa3   : > { %2814 = dma.done.wait (%p3402_p2), %s479_s15, 512  }
  0xa4   : > { %2816 = vsyncadd (%p3402_p2), %s479_s15, 4294966784  ;;  %s487_s5 = sand.u32 1, %s2959_s27   ;;  %s3187_s28 = scalar_lea.vmem [#allocation5], %s2029_s30 }
  0xa5   : > { %s488_s10 = scalar_lea.sflag [#allocation6], %s487_s5 }
  0xa6   : > { %2818 = dma.done.wait (%p3402_p2), %s488_s10, 512  }
  0xa7   : > { %2820 = vsyncadd (%p3402_p2), %s488_s10, 4294966784  ;;  %p3403_p3 = scmp.eq.s32.totalorder %s2959_s27, 0 }
  0xa9   : > { %2822 = dma.done.wait (%p3403_p3), [#allocation6], 1024   ;;  %p3404_p7 = pmov %p3403_p3 }
  0xaa   : > { %p3405_p6 = pmov %p3403_p3 }
  0xab   : > { %2824 = vsyncadd (%p3404_p7), [#allocation6], 4294966272 }
  0xac   : > { %2826 = dma.done.wait (%p3405_p6), [#allocation9], 2048   ;;  %p3406_p0 = pmov %p3403_p3 }
  0xae   : > { %2828 = vsyncadd (%p3406_p0), [#allocation9], 4294965248  ;;  %p3407_p8 = pmov %p3406_p0 }
  0xaf   : > { %p3408_p10 = pmov %p3406_p0 }
  0xb0   : > { %2830 = dma.done.wait (%p3407_p8), [#allocation12], 2048  }
  0xb1   : > { %2832 = vsyncadd (%p3408_p10), [#allocation12], 4294965248  ;;  %p3409_p11 = pmov %p3406_p0 }
  0xb2   : > { %p3410_p13 = pmov %p3406_p0 }
  0xb3   : > { %2834 = dma.done.wait (%p3409_p11), [#allocation15], 1024  }
  0xb4   : > { %2836 = vsyncadd (%p3410_p13), [#allocation15], 4294966272  ;;  %v2867_v0 = vmov 0.0   ;;  %vm2868_vm0 = vmmov 0   ;;  %v2503_v1 = vld [vmem:[%s3180_s23] sm:$0xff]   ;;  %v3217_v2 = vld [vmem:[%s3180_s23 + $0x8] sm:$0xff]  }
  0xb5   : > { %2200 = vmatprep.subr.bf16.mxu0 %v2867_v0  ;;  %2206 = vmatprep.subr.bf16.mxu1 %v2867_v0  ;;  %v3220_v3 = vld [vmem:[%s3187_s28] sm:$0xff]   ;;  %vm625_vm1 = vcmask 130048   ;;  %v3224_v4 = vld [vmem:[%s3187_s28 + $0x8] sm:$0xff]   ;;  %v2507_v5 = vld [vmem:[%s3180_s23 + $0x10] sm:$0xff]   ;;  %vm1603_vm2 = vcmask 1041409   ;;  %vm1605_vm3 = vcmask 1042434  }
  0xb6   : > { %2202 = vmatprep.mubr.msk.bf16.mxu0 %vm2868_vm0, %v2867_v0  ;;  %2208 = vmatprep.mubr.msk.bf16.mxu1 %vm2868_vm0, %v2867_v0  ;;  %v2508_v6 = vld [vmem:[%s3180_s23 + $0x18] sm:$0xff]   ;;  %v3237_v7 = vld [vmem:[%s3187_s28 + $0x10] sm:$0xff]   ;;  %v2517_v13 = vld [vmem:[#allocation8 + $0x28] sm:$0xff]   ;;  %vm1607_vm4 = vcmask 1043459   ;;  %s2037_s3 = sshll.u32 %s3176_s0, 2  ;;  %s2117_s30 = sshll.u32 %s2959_s27, 6 }
  0xb7   : > { %2201 = vmatpush3.bf16.msra.mxu0 %v2503_v1  ;;  %2207 = vmatpush3.bf16.msra.mxu1 %v3217_v2  ;;  %v2511_v8 = vld [vmem:[#allocation7 + $0x38] sm:$0xff]   ;;  %v2512_v11 = vld [vmem:[#allocation7 + $0x30] sm:$0xff]   ;;  %v2514_v14 = vld [vmem:[#allocation7 + $0x28] sm:$0xff]   ;;  %s560_s14 = scalar_lea.vmem [#allocation16], %s2037_s3  ;;  %s3312_s5 = scalar_lea.hbm %s3367_s12, %s2117_s30 }
  0xb8   : > { %2212 = vmatprep.subr.bf16.mxu0 %v2867_v0  ;;  %2218 = vmatprep.subr.bf16.mxu1 %v2867_v0  ;;  %v3242_v9 = vld [vmem:[%s3187_s28 + $0x18] sm:$0xff]   ;;  %v2515_v12 = vld [vmem:[#allocation8 + $0x30] sm:$0xff]   ;;  %v2519_v15 = vld [vmem:[#allocation8 + $0x20] sm:$0xff]   ;;  %s1858_s6 = sshll.u32 %s560_s14, 4  ;;  %s1845_s10 = scalar_lea.sflag [#allocation4], %s3176_s0  ;;  %s3307_s6 = int_to_ptr.vmem [resolvable:$true] %s1858_s6 }
  0xb9   : > { %v2513_v10 = vld [vmem:[#allocation8 + $0x38] sm:$0xff]   ;;  %v2516_v16 = vld [vmem:[#allocation7 + $0x20] sm:$0xff]   ;;  %v2523_v19 = vld [vmem:[#allocation8 + $0x10] sm:$0xff]   ;;  %s2771_s28 = scalar_lea.vmem %s3307_s6, 64  ;;  %p3411_p9 = scmp.ne.s32.totalorder %s3396_s20, 0 }
  0xba   : > { %2203 = vmatmul.mubr.msk.bf16.vlgmr.msra.gmra.mxu0 %vm625_vm1, %v3220_v3  ;;  %2209 = vmatmul.mubr.msk.bf16.vlgmr.msra.gmra.mxu1 %vm625_vm1, %v3224_v4  ;;  %v2521_v17 = vld [vmem:[#allocation8 + $0x18] sm:$0xff]   ;;  %v2520_v20 = vld [vmem:[#allocation7 + $0x10] sm:$0xff]   ;;  %v2522_v21 = vld [vmem:[#allocation7 + $0x8] sm:$0xff]   ;;  %p2772_p5 = scmp.ne.s32.totalorder %s3307_s6, %s2771_s28  ;;  %s2870_s27 = smov [#allocation16]  }
  0xbb   : > { %2213 = vmatpush3.bf16.msra.mxu0 %v2507_v5  ;;  %2219 = vmatpush3.bf16.msra.mxu1 %v2508_v6  ;;  %v2518_v18 = vld [vmem:[#allocation7 + $0x18] sm:$0xff]   ;;  %v2524_v22 = vld [vmem:[#allocation7] sm:$0xff]   ;;  %v2525_v23 = vld [vmem:[#allocation8 + $0x8] sm:$0xff]   ;;  %s2775_s26 = sshll.u32 %s2870_s27, 4  ;;  %s2776_s26 = int_to_ptr.vmem [resolvable:$false] %s2775_s26 }
  0xbc   : > { %2214 = vmatprep.mubr.msk.bf16.mxu0 %vm2868_vm0, %v2867_v0  ;;  %2220 = vmatprep.mubr.msk.bf16.mxu1 %vm2868_vm0, %v2867_v0  ;;  %v2526_v24 = vld [vmem:[#allocation8] sm:$0xff]   ;;  %p2773_p1 = pnand %p2772_p5, %p3411_p9  ;;  %s2777_s18 = scalar_lea.vmem %s2776_s26, 128 }
  0xbd   : > { %2248 = vmatprep.subr.bf16.mxu1 %v2511_v8  ;;  %2224 = vmatprep.subr.bf16.mxu0 %v2513_v10  ;;  %v2066_v51 = vld [vmem:[%s3359_s4] ss:$0 sm:$0xff]  ;;  %p2778_p12 = scmp.lt.s32.totalorder %s3307_s6, %s2776_s26  ;;  %p2779_p2 = scmp.lt.s32.totalorder %s2777_s18, %s2771_s28 }
  0xbe   : > { %p2774_p4 = pneg %p2773_p1 }
  0xbf   : > { %p2780_p3 = por %p2779_p2, %p2778_p12 }
  0xc1   : > { %p2781_p7 = pnand %p2780_p3, %p2774_p4 }
  0xc2   : > { %2215 = vmatmul.mubr.msk.bf16.vlgmr.msra.gmra.mxu0 %vm625_vm1, %v3237_v7  ;;  %2221 = vmatmul.mubr.msk.bf16.vlgmr.msra.gmra.mxu1 %vm625_vm1, %v3242_v9 }
  0xc3   : > { %2225 = vmatpush3.bf16.msra.mxu0 %v2513_v10  ;;  %2249 = vmatpush3.bf16.msra.mxu1 %v2511_v8 }
  0xc4   : > { %2226 = vmatprep.subr.bf16.mxu0 %v2515_v12  ;;  %2250 = vmatprep.subr.bf16.mxu1 %v2512_v11 }
  0xc5   : > { %2264 = vmatprep.mubr.bf16.mxu1 %v2503_v1 }
  0xc7   : > { %2227 = vmatpush3.bf16.msra.mxu0 %v2515_v12  ;;  %2251 = vmatpush3.bf16.msra.mxu1 %v2512_v11 }
  0xc8   : > { %2228 = vmatprep.subr.bf16.mxu0 %v2517_v13  ;;  %2252 = vmatprep.subr.bf16.mxu1 %v2514_v14 }
  0xcb   : > { %2229 = vmatpush3.bf16.msra.mxu0 %v2517_v13  ;;  %2253 = vmatpush3.bf16.msra.mxu1 %v2514_v14 }
  0xcc   : > { %2230 = vmatprep.subr.bf16.mxu0 %v2519_v15  ;;  %2254 = vmatprep.subr.bf16.mxu1 %v2516_v16 }
  0xcf   : > { %2231 = vmatpush3.bf16.msra.mxu0 %v2519_v15  ;;  %2255 = vmatpush3.bf16.msra.mxu1 %v2516_v16 }
  0xd0   : > { %2232 = vmatprep.subr.bf16.mxu0 %v2521_v17  ;;  %2256 = vmatprep.subr.bf16.mxu1 %v2518_v18 }
  0xd3   : > { %2233 = vmatpush3.bf16.msra.mxu0 %v2521_v17  ;;  %2257 = vmatpush3.bf16.msra.mxu1 %v2518_v18 }
  0xd4   : > { %2234 = vmatprep.subr.bf16.mxu0 %v2523_v19  ;;  %2258 = vmatprep.subr.bf16.mxu1 %v2520_v20 }
  0xd7   : > { %2235 = vmatpush3.bf16.msra.mxu0 %v2523_v19  ;;  %2259 = vmatpush3.bf16.msra.mxu1 %v2520_v20 }
  0xd8   : > { %2260 = vmatprep.subr.bf16.mxu1 %v2522_v21  ;;  %2236 = vmatprep.subr.bf16.mxu0 %v2525_v23 }
  0xdb   : > { %2261 = vmatpush3.bf16.msra.mxu1 %v2522_v21  ;;  %2237 = vmatpush3.bf16.msra.mxu0 %v2525_v23 }
  0xdc   : > { %2262 = vmatprep.subr.bf16.mxu1 %v2524_v22  ;;  %2238 = vmatprep.subr.bf16.mxu0 %v2526_v24 }
  0xdf   : > { %2263 = vmatpush3.bf16.msra.mxu1 %v2524_v22  ;;  %2239 = vmatpush3.bf16.msra.mxu0 %v2526_v24 }
  0xe0   : > { %2278 = vmatprep.subr.bf16.mxu1 %v2867_v0  ;;  %2272 = vmatprep.subr.bf16.mxu0 %v2867_v0 }
  0xe2   : > { %2265 = vmatmul.mubr.bf16.vlgmr.msra.gmra.mxu1 %v3217_v2 }
  0xe3   : > { %2268 = vmatprep.mubr.bf16.mxu1 %v2507_v5 }
  0xea   : > { %2269 = vmatmul.mubr.bf16.gmra.mxu1 %v2508_v6 }
  0xeb   : > { %2280 = vmatprep.mubr.msk.bf16.mxu1 %vm2868_vm0, %v2867_v0 }
 0x17a   : > { %v663_v25 = vpop.f32.mrf.mxu0  ;;  %v718_v26 = vpop.f32.mrf.mxu1 }
 0x17c   : > { %v2204_v27 = vpop.f32.mrf.mxu0  ;;  %v2210_v28 = vpop.f32.mrf.mxu1 }
 0x17d   : > { %v2527_v27 = vld [vmem:[#allocation10 + $0x38] sm:$0xff]  }
 0x17e   : > { %v666_v29 = vpop.f32.mrf.mxu0  ;;  %v721_v31 = vpop.f32.mrf.mxu1 }
 0x17f   : > { %v835_v30 = vpack.c.bf16 %v666_v29, %v663_v25  ;;  %v836_v32 = vpack.c.bf16 %v721_v31, %v718_v26  ;;  %v2535_v31 = vld [vmem:[#allocation11 + $0x38] sm:$0xff]  }
 0x180   : > { %v2205_v33 = vpop.f32.mrf.mxu0  ;;  %v2211_v34 = vpop.f32.mrf.mxu1 }
 0x181   : > { %2240 = vmatprep.mubr.bf16.mxu0 %v835_v30  ;;  %v2536_v33 = vld [vmem:[#allocation11 + $0x30] sm:$0xff]   ;;  %v2537_v34 = vld [vmem:[#allocation11 + $0x28] sm:$0xff]  }
 0x182   : > { %v773_v35 = vpop.f32.mrf.mxu0  ;;  %2241 = vmatmul.mubr.bf16.vlgmr.msra.gmra.mxu0 %v836_v32  ;;  %v828_v36 = vpop.f32.mrf.mxu1  ;;  %v2528_v32 = vld [vmem:[#allocation10 + $0x30] sm:$0xff]  }
 0x184   : > { %v2216_v37 = vpop.f32.mrf.mxu0  ;;  %v2222_v38 = vpop.f32.mrf.mxu1 }
 0x185   : > { %v2539_v37 = vld [vmem:[#allocation11 + $0x18] sm:$0xff]   ;;  %v2540_v38 = vld [vmem:[#allocation11 + $0x10] sm:$0xff]  }
 0x186   : > { %v776_v39 = vpop.f32.mrf.mxu0  ;;  %v831_v41 = vpop.f32.mrf.mxu1 }
 0x187   : > { %v837_v40 = vpack.c.bf16 %v776_v39, %v773_v35  ;;  %v838_v42 = vpack.c.bf16 %v831_v41, %v828_v36  ;;  %v2530_v35 = vld [vmem:[#allocation10 + $0x20] sm:$0xff]   ;;  %v2533_v39 = vld [vmem:[#allocation10 + $0x8] sm:$0xff]  }
 0x188   : > { %v2217_v43 = vpop.f32.mrf.mxu0  ;;  %v2223_v44 = vpop.f32.mrf.mxu1  ;;  %v2538_v36 = vld [vmem:[#allocation11 + $0x20] sm:$0xff]   ;;  %v2541_v41 = vld [vmem:[#allocation11 + $0x8] sm:$0xff]  }
 0x189   : > { %2244 = vmatprep.mubr.bf16.mxu0 %v837_v40  ;;  %v2534_v40 = vld [vmem:[#allocation10] sm:$0xff]  }
 0x18a   : > { %2245 = vmatmul.mubr.bf16.gmra.mxu0 %v838_v42  ;;  %v2542_v42 = vld [vmem:[#allocation11] sm:$0xff]  }
 0x18b   : > { %2274 = vmatprep.mubr.msk.bf16.mxu0 %vm2868_vm0, %v2867_v0 }
 0x1a2   : > { %v2266_v45 = vpop.f32.mrf.mxu1 }
 0x1a4   : > { %v1034_v46 = vpop.f32.mrf.mxu1 }
 0x1a6   : > { %v2267_v47 = vpop.f32.mrf.mxu1 }
 0x1a8   : > { %v1037_v48 = vpop.f32.mrf.mxu1 }
 0x1aa   : > { %v2270_v53 = vpop.f32.mrf.mxu1 }
 0x1ac   : > { %v1050_v59 = vpop.f32.mrf.mxu1 }
 0x1ae   : > { %v2271_v10 = vpop.f32.mrf.mxu1 }
 0x1b0   : > { %v1053_v20 = vpop.f32.mrf.mxu1 }
 0x242   : > { %v2242_v49 = vpop.f32.mrf.mxu0 }
 0x243   : > { %v1043_v50 = vadd.f32 %v2266_v45, %v2242_v49 }
 0x244   : > { %v921_v52 = vpop.f32.mrf.mxu0 }
 0x245   : > { %v1035_v54 = vadd.f32 %v1034_v46, %v921_v52  ;;  %v1073_v56 = vadd.f32 %v2066_v51, %v1043_v50 }
 0x246   : > { %v2243_v55 = vpop.f32.mrf.mxu0 }
 0x247   : > { %v1046_v57 = vadd.f32 %v2267_v47, %v2243_v55  ;;  %v1071_v60 = vadd.f32 %v2066_v51, %v1035_v54  ;;  %v1081_v1 = vmax.f32 %v1073_v56, 0.0 }
 0x248   : > { %v924_v58 = vpop.f32.mrf.mxu0 }
 0x249   : > { %v1074_v61 = vadd.f32 %v2066_v51, %v1046_v57  ;;  %v1038_v62 = vadd.f32 %v1037_v48, %v924_v58  ;;  %v1079_v11 = vmax.f32 %v1071_v60, 0.0 }
 0x24a   : > { %v2246_v63 = vpop.f32.mrf.mxu0 }
 0x24b   : > { %v1082_v2 = vmax.f32 %v1074_v61, 0.0  ;;  %v1072_v5 = vadd.f32 %v2066_v51, %v1038_v62  ;;  %v1059_v6 = vadd.f32 %v2270_v53, %v2246_v63  ;;  %v2543_v63 = vld [vmem:[#allocation13 + $0x38] sm:$0xff]  }
 0x24c   : > { %v937_v8 = vpop.f32.mrf.mxu0 }
 0x24d   : > { %v3258_v12 = vpack.c.bf16 %v1082_v2, %v1081_v1  ;;  %v1080_v13 = vmax.f32 %v1072_v5, 0.0  ;;  %v1051_v14 = vadd.f32 %v1050_v59, %v937_v8  ;;  %v1077_v17 = vadd.f32 %v2066_v51, %v1059_v6  ;;  %v2544_v1 = vld [vmem:[#allocation13 + $0x30] sm:$0xff]   ;;  %v2545_v2 = vld [vmem:[#allocation13 + $0x28] sm:$0xff]   ;;  %v2546_v5 = vld [vmem:[#allocation13 + $0x20] sm:$0xff]  }
 0x24e   : > { %v2247_v15 = vpop.f32.mrf.mxu0  ;;  %v2547_v6 = vld [vmem:[#allocation13 + $0x18] sm:$0xff]   ;;  %v2548_v8 = vld [vmem:[#allocation13 + $0x10] sm:$0xff]  }
 0x24f   : > { %v1087_v16 = vpack.c.bf16 %v1080_v13, %v1079_v11  ;;  %v1062_v18 = vadd.f32 %v2271_v10, %v2247_v15  ;;  %2279 = vmatpush3.bf16.msra.mxu1 %v3258_v12  ;;  %v1075_v21 = vadd.f32 %v2066_v51, %v1051_v14  ;;  %v1085_v24 = vmax.f32 %v1077_v17, 0.0  ;;  %v2549_v10 = vld [vmem:[#allocation13 + $0x8] sm:$0xff]   ;;  %v2550_v11 = vld [vmem:[#allocation13] sm:$0xff]   ;;  %v2552_v13 = vld [vmem:[#allocation14 + $0x30] sm:$0xff]  }
 0x250   : > { %v940_v19 = vpop.f32.mrf.mxu0  ;;  %2290 = vmatprep.subr.bf16.mxu1 %v2867_v0  ;;  %v2553_v14 = vld [vmem:[#allocation14 + $0x28] sm:$0xff]   ;;  %v2554_v15 = vld [vmem:[#allocation14 + $0x20] sm:$0xff]   ;;  %v2556_v17 = vld [vmem:[#allocation14 + $0x10] sm:$0xff]  }
 0x251   : > { %v1078_v22 = vadd.f32 %v2066_v51, %v1062_v18  ;;  %v1054_v23 = vadd.f32 %v1053_v20, %v940_v19  ;;  %2273 = vmatpush3.bf16.msra.mxu0 %v1087_v16  ;;  %v1083_v28 = vmax.f32 %v1075_v21, 0.0  ;;  %v2557_v18 = vld [vmem:[#allocation14 + $0x8] sm:$0xff]  }
 0x252   : > { %2281 = vmatmul.mubr.msk.bf16.vlgmr.msra.gmra.mxu1 %vm625_vm1, %v3224_v4  ;;  %2284 = vmatprep.subr.bf16.mxu0 %v2867_v0 }
 0x253   : > { %v1086_v25 = vmax.f32 %v1078_v22, 0.0  ;;  %v1076_v26 = vadd.f32 %v2066_v51, %v1054_v23  ;;  %2292 = vmatprep.mubr.msk.bf16.mxu1 %vm2868_vm0, %v2867_v0 }
 0x254   : > { %2275 = vmatmul.mubr.msk.bf16.vlgmr.msra.gmra.mxu0 %vm625_vm1, %v3220_v3  ;;  %v2529_v3 = vld [vmem:[#allocation10 + $0x28] sm:$0xff]  }
 0x255   : > { %v1090_v29 = vpack.c.bf16 %v1086_v25, %v1085_v24  ;;  %v1084_v30 = vmax.f32 %v1076_v26, 0.0  ;;  %2286 = vmatprep.mubr.msk.bf16.mxu0 %vm2868_vm0, %v2867_v0  ;;  %v2087_v26 = vld [vmem:[%s3362_s7] ss:$0 sm:$0xff] }
 0x257   : > { %v1089_v4 = vpack.c.bf16 %v1084_v30, %v1083_v28  ;;  %2291 = vmatpush3.bf16.msra.mxu1 %v1090_v29 }
 0x258   : > { %2320 = vmatprep.subr.bf16.mxu1 %v2527_v27 }
 0x259   : > { %2285 = vmatpush3.bf16.msra.mxu0 %v1089_v4 }
 0x25a   : > { %2293 = vmatmul.mubr.msk.bf16.vlgmr.msra.gmra.mxu1 %vm625_vm1, %v3242_v9  ;;  %2296 = vmatprep.subr.bf16.mxu0 %v2535_v31  ;;  %v2531_v9 = vld [vmem:[#allocation10 + $0x18] sm:$0xff]  }
 0x25b   : > { %2321 = vmatpush3.bf16.msra.mxu1 %v2527_v27  ;;  %2336 = vmatprep.mubr.bf16.mxu1 %v1087_v16  ;;  %v2555_v16 = vld [vmem:[#allocation14 + $0x18] sm:$0xff]  }
 0x25c   : > { %2287 = vmatmul.mubr.msk.bf16.vlgmr.msra.gmra.mxu0 %vm625_vm1, %v3237_v7  ;;  %2322 = vmatprep.subr.bf16.mxu1 %v2528_v32  ;;  %v2532_v7 = vld [vmem:[#allocation10 + $0x10] sm:$0xff]  }
 0x25d   : > { %2297 = vmatpush3.bf16.msra.mxu0 %v2535_v31 }
 0x25e   : > { %2298 = vmatprep.subr.bf16.mxu0 %v2536_v33 }
 0x25f   : > { %2323 = vmatpush3.bf16.msra.mxu1 %v2528_v32 }
 0x260   : > { %2324 = vmatprep.subr.bf16.mxu1 %v2529_v3 }
 0x261   : > { %2299 = vmatpush3.bf16.msra.mxu0 %v2536_v33 }
 0x262   : > { %2300 = vmatprep.subr.bf16.mxu0 %v2537_v34 }
 0x263   : > { %2325 = vmatpush3.bf16.msra.mxu1 %v2529_v3 }
 0x264   : > { %2326 = vmatprep.subr.bf16.mxu1 %v2530_v35 }
 0x265   : > { %2301 = vmatpush3.bf16.msra.mxu0 %v2537_v34 }
 0x266   : > { %2302 = vmatprep.subr.bf16.mxu0 %v2538_v36 }
 0x267   : > { %2327 = vmatpush3.bf16.msra.mxu1 %v2530_v35 }
 0x268   : > { %2328 = vmatprep.subr.bf16.mxu1 %v2531_v9 }
 0x269   : > { %2303 = vmatpush3.bf16.msra.mxu0 %v2538_v36 }
 0x26a   : > { %2304 = vmatprep.subr.bf16.mxu0 %v2539_v37 }
 0x26b   : > { %2329 = vmatpush3.bf16.msra.mxu1 %v2531_v9 }
 0x26c   : > { %2330 = vmatprep.subr.bf16.mxu1 %v2532_v7 }
 0x26d   : > { %2305 = vmatpush3.bf16.msra.mxu0 %v2539_v37 }
 0x26e   : > { %2306 = vmatprep.subr.bf16.mxu0 %v2540_v38 }
 0x26f   : > { %2331 = vmatpush3.bf16.msra.mxu1 %v2532_v7 }
 0x270   : > { %2332 = vmatprep.subr.bf16.mxu1 %v2533_v39 }
 0x271   : > { %2307 = vmatpush3.bf16.msra.mxu0 %v2540_v38 }
 0x272   : > { %2308 = vmatprep.subr.bf16.mxu0 %v2541_v41 }
 0x273   : > { %2333 = vmatpush3.bf16.msra.mxu1 %v2533_v39 }
 0x274   : > { %2334 = vmatprep.subr.bf16.mxu1 %v2534_v40 }
 0x275   : > { %2309 = vmatpush3.bf16.msra.mxu0 %v2541_v41 }
 0x276   : > { %2310 = vmatprep.subr.bf16.mxu0 %v2542_v42 }
 0x277   : > { %2335 = vmatpush3.bf16.msra.mxu1 %v2534_v40 }
 0x278   : > { %2364 = vmatprep.subr.bf16.mxu1 %v2867_v0 }
 0x279   : > { %2311 = vmatpush3.bf16.msra.mxu0 %v2542_v42 }
 0x27a   : > { %2337 = vmatmul.mubr.bf16.vlgmr.msra.gmra.mxu1 %v3258_v12  ;;  %2344 = vmatprep.subr.bf16.mxu0 %v2867_v0  ;;  %v2551_v12 = vld [vmem:[#allocation14 + $0x38] sm:$0xff]  }
 0x27b   : > { %2340 = vmatprep.mubr.bf16.mxu1 %v1089_v4  ;;  %2365 = vmatpush3.bf16.msra.mxu1 %v2551_v12 }
 0x27c   : > { %2366 = vmatprep.subr.bf16.mxu1 %v2867_v0 }
 0x27f   : > { %2367 = vmatpush3.bf16.msra.mxu1 %v2552_v13 }
 0x280   : > { %2368 = vmatprep.subr.bf16.mxu1 %v2867_v0 }
 0x282   : > { %2341 = vmatmul.mubr.bf16.gmra.mxu1 %v1090_v29 }
 0x283   : > { %2380 = vmatprep.mubr.msk.bf16.mxu1 %vm2868_vm0, %v2867_v0  ;;  %2369 = vmatpush3.bf16.msra.mxu1 %v2553_v14 }
 0x284   : > { %2370 = vmatprep.subr.bf16.mxu1 %v2867_v0 }
 0x287   : > { %2371 = vmatpush3.bf16.msra.mxu1 %v2554_v15 }
 0x288   : > { %2372 = vmatprep.subr.bf16.mxu1 %v2867_v0 }
 0x28b   : > { %2373 = vmatpush3.bf16.msra.mxu1 %v2555_v16 }
 0x28c   : > { %2374 = vmatprep.subr.bf16.mxu1 %v2867_v0 }
 0x28f   : > { %2375 = vmatpush3.bf16.msra.mxu1 %v2556_v17 }
 0x290   : > { %2376 = vmatprep.subr.bf16.mxu1 %v2867_v0 }
 0x293   : > { %2377 = vmatpush3.bf16.msra.mxu1 %v2557_v18 }
 0x294   : > { %2378 = vmatprep.subr.bf16.mxu1 %v2867_v0 }
 0x312   : > { %v1199_v43 = vpop.f32.mrf.mxu1 }
 0x314   : > { %v1158_v44 = vpop.f32.mrf.mxu0  ;;  %v2282_v45 = vpop.f32.mrf.mxu1 }
 0x316   : > { %v2276_v46 = vpop.f32.mrf.mxu0  ;;  %v1202_v47 = vpop.f32.mrf.mxu1 }
 0x317   : > { %v1289_v51 = vpack.c.bf16 %v1202_v47, %v1199_v43 }
 0x318   : > { %v1161_v48 = vpop.f32.mrf.mxu0  ;;  %v2283_v49 = vpop.f32.mrf.mxu1 }
 0x319   : > { %v1288_v50 = vpack.c.bf16 %v1161_v48, %v1158_v44 }
 0x31a   : > { %v2277_v52 = vpop.f32.mrf.mxu0  ;;  %v1281_v53 = vpop.f32.mrf.mxu1 }
 0x31b   : > { %2312 = vmatprep.mubr.bf16.mxu0 %v1288_v50 }
 0x31c   : > { %v1240_v54 = vpop.f32.mrf.mxu0  ;;  %2313 = vmatmul.mubr.bf16.vlgmr.msra.gmra.mxu0 %v1289_v51  ;;  %v2294_v55 = vpop.f32.mrf.mxu1 }
 0x31d   : > { %2345 = vmatpush3.bf16.msra.mxu0 %v2543_v63 }
 0x31e   : > { %v2288_v56 = vpop.f32.mrf.mxu0  ;;  %v1284_v57 = vpop.f32.mrf.mxu1  ;;  %2346 = vmatprep.subr.bf16.mxu0 %v2867_v0 }
 0x31f   : > { %v1291_v61 = vpack.c.bf16 %v1284_v57, %v1281_v53 }
 0x320   : > { %v1243_v58 = vpop.f32.mrf.mxu0  ;;  %v2295_v59 = vpop.f32.mrf.mxu1 }
 0x321   : > { %v1290_v60 = vpack.c.bf16 %v1243_v58, %v1240_v54  ;;  %2347 = vmatpush3.bf16.msra.mxu0 %v2544_v1 }
 0x322   : > { %v2289_v62 = vpop.f32.mrf.mxu0  ;;  %2348 = vmatprep.subr.bf16.mxu0 %v2867_v0 }
 0x323   : > { %2316 = vmatprep.mubr.bf16.mxu0 %v1290_v60 }
 0x324   : > { %2317 = vmatmul.mubr.bf16.gmra.mxu0 %v1291_v61 }
 0x325   : > { %2360 = vmatprep.mubr.msk.bf16.mxu0 %vm2868_vm0, %v2867_v0  ;;  %2349 = vmatpush3.bf16.msra.mxu0 %v2545_v2 }
 0x326   : > { %2350 = vmatprep.subr.bf16.mxu0 %v2867_v0 }
 0x329   : > { %2351 = vmatpush3.bf16.msra.mxu0 %v2546_v5 }
 0x32a   : > { %2352 = vmatprep.subr.bf16.mxu0 %v2867_v0 }
 0x32d   : > { %2353 = vmatpush3.bf16.msra.mxu0 %v2547_v6 }
 0x32e   : > { %2354 = vmatprep.subr.bf16.mxu0 %v2867_v0 }
 0x331   : > { %2355 = vmatpush3.bf16.msra.mxu0 %v2548_v8 }
 0x332   : > { %2356 = vmatprep.subr.bf16.mxu0 %v2867_v0 }
 0x335   : > { %2357 = vmatpush3.bf16.msra.mxu0 %v2549_v10 }
 0x336   : > { %2358 = vmatprep.subr.bf16.mxu0 %v2867_v0 }
 0x339   : > { %2359 = vmatpush3.bf16.msra.mxu0 %v2550_v11 }
 0x33a   : > { %v2338_v19 = vpop.f32.mrf.mxu1 }
 0x33c   : > { %v1487_v20 = vpop.f32.mrf.mxu1 }
 0x33e   : > { %v2339_v21 = vpop.f32.mrf.mxu1 }
 0x340   : > { %v1490_v22 = vpop.f32.mrf.mxu1 }
 0x342   : > { %v2342_v25 = vpop.f32.mrf.mxu1 }
 0x344   : > { %v1503_v4 = vpop.f32.mrf.mxu1 }
 0x346   : > { %v2343_v37 = vpop.f32.mrf.mxu1 }
 0x348   : > { %v1506_v46 = vpop.f32.mrf.mxu1 }
 0x3dc   : > { %v2314_v23 = vpop.f32.mrf.mxu0 }
 0x3dd   : > { %v1496_v24 = vadd.f32 %v2338_v19, %v2314_v23 }
 0x3de   : > { %v1374_v27 = vpop.f32.mrf.mxu0 }
 0x3df   : > { %v1488_v28 = vadd.f32 %v1487_v20, %v1374_v27  ;;  %v1526_v30 = vadd.f32 %v2087_v26, %v1496_v24 }
 0x3e0   : > { %v2315_v29 = vpop.f32.mrf.mxu0 }
 0x3e1   : > { %v1499_v31 = vadd.f32 %v2339_v21, %v2315_v29  ;;  %v1524_v33 = vadd.f32 %v2087_v26, %v1488_v28  ;;  %v1534_v35 = vmax.f32 %v1526_v30, 0.0 }
 0x3e2   : > { %v1377_v32 = vpop.f32.mrf.mxu0 }
 0x3e3   : > { %v1527_v0 = vadd.f32 %v2087_v26, %v1499_v31  ;;  %v1491_v3 = vadd.f32 %v1490_v22, %v1377_v32  ;;  %v1532_v39 = vmax.f32 %v1524_v33, 0.0 }
 0x3e4   : > { %v2318_v34 = vpop.f32.mrf.mxu0 }
 0x3e5   : > { %v1535_v36 = vmax.f32 %v1527_v0, 0.0  ;;  %v1525_v9 = vadd.f32 %v2087_v26, %v1491_v3  ;;  %v1512_v7 = vadd.f32 %v2342_v25, %v2318_v34  ;;  %v2558_v3 = vld [vmem:[#allocation14] sm:$0xff]  }
 0x3e6   : > { %v1390_v38 = vpop.f32.mrf.mxu0  ;;  %2379 = vmatpush3.bf16.msra.mxu1 %v2558_v3  ;;  %v2088_v34 = vld [vmem:[%s3364_s9] ss:$0 sm:$0xff] }
 0x3e7   : > { %v1547_v40 = vmax.f32 %v1534_v35, %v1535_v36  ;;  %v1533_v41 = vmax.f32 %v1525_v9, 0.0  ;;  %v1504_v42 = vadd.f32 %v1503_v4, %v1390_v38  ;;  %v1530_v47 = vadd.f32 %v2087_v26, %v1512_v7 }
 0x3e8   : > { %v2319_v43 = vpop.f32.mrf.mxu0 }
 0x3e9   : > { %v1548_v44 = vrot.slane %v1547_v40, 4  ;;  %v1540_v45 = vmax.f32 %v1532_v39, %v1533_v41  ;;  %v1515_v48 = vadd.f32 %v2343_v37, %v2319_v43  ;;  %v1528_v52 = vadd.f32 %v2087_v26, %v1504_v42 }
 0x3ea   : > { %v1393_v49 = vpop.f32.mrf.mxu0  ;;  %v1538_v58 = vmax.f32 %v1530_v47, 0.0  ;;  %v2869_v39 = vmov 1966171168   ;;  %v1815_v41 = vlaneseq }
 0x3eb   : > { %v1549_v50 = vmax.f32 %v1547_v40, %v1548_v44  ;;  %v1541_v51 = vrot.slane %v1540_v45, 4  ;;  %v1507_v53 = vadd.f32 %v1506_v46, %v1393_v49  ;;  %v1531_v54 = vadd.f32 %v2087_v26, %v1515_v48  ;;  %v2097_v44 = vld [vmem:[%s3366_s11] ss:$0 sm:$0xff] }
 0x3ec   : > { %v1536_v61 = vmax.f32 %v1528_v52, 0.0  ;;  %v1813_v40 = vunpack.c.l.s4 %v2869_v39  ;;  %v1816_v43 = vshrl.u32 %v1815_v41, 7 }
 0x3ed   : > { %v1550_v55 = vrot.slane %v1549_v50, 2  ;;  %v1542_v56 = vmax.f32 %v1540_v45, %v1541_v51  ;;  %v1529_v57 = vadd.f32 %v2087_v26, %v1507_v53  ;;  %v1539_v59 = vmax.f32 %v1531_v54, 0.0 }
 0x3ee   : > { %v1814_v42 = vunpack.c.0.s8 %v1813_v40 }
 0x3ef   : > { %v1543_v60 = vrot.slane %v1542_v56, 2  ;;  %v1537_v62 = vmax.f32 %v1529_v57, 0.0  ;;  %v1551_v63 = vmax.f32 %v1549_v50, %v1550_v55  ;;  %v1561_v1 = vmax.f32 %v1538_v58, %v1539_v59 }
 0x3f0   : > { %v1817_v45 = vsub.s32 %v1814_v42, %v1816_v43 }
 0x3f1   : > { %v1544_v2 = vmax.f32 %v1542_v56, %v1543_v60  ;;  %v1554_v5 = vmax.f32 %v1536_v61, %v1537_v62  ;;  %v1562_v6 = vrot.slane %v1561_v1, 4  ;;  %v1552_v11 = vrot.slane %v1551_v63, 1 }
 0x3f3   : > { %v1545_v8 = vrot.slane %v1544_v2, 1  ;;  %v1555_v10 = vrot.slane %v1554_v5, 4  ;;  %v1563_v12 = vmax.f32 %v1561_v1, %v1562_v6  ;;  %v1553_v17 = vmax.f32 %v1551_v63, %v1552_v11 }
 0x3f5   : > { %v1556_v13 = vmax.f32 %v1554_v5, %v1555_v10  ;;  %v1546_v14 = vmax.f32 %v1544_v2, %v1545_v8  ;;  %v1564_v15 = vrot.slane %v1563_v12, 2  ;;  %v1569_v23 = vpack.c.bf16 %v1553_v17, %v1553_v17 }
 0x3f7   : > { %v1557_v16 = vrot.slane %v1556_v13, 2  ;;  %v1565_v18 = vmax.f32 %v1563_v12, %v1564_v15  ;;  %v1568_v20 = vpack.c.bf16 %v1546_v14, %v1546_v14  ;;  %v1600_v29 = vunpack.c.l.b16 %v1569_v23 }
 0x3f9   : > { %v1558_v19 = vmax.f32 %v1556_v13, %v1557_v16  ;;  %v1566_v21 = vrot.slane %v1565_v18, 1  ;;  %v1599_v26 = vunpack.c.l.b16 %v1568_v20 }
 0x3fb   : > { %v1559_v22 = vrot.slane %v1558_v19, 1  ;;  %v1567_v24 = vmax.f32 %v1565_v18, %v1566_v21  ;;  %v1604_v31 = vsel %vm1603_vm2, %v1600_v29, %v1599_v26 }
 0x3fd   : > { %v1560_v25 = vmax.f32 %v1558_v19, %v1559_v22  ;;  %v1571_v27 = vpack.c.bf16 %v1567_v24, %v1567_v24 }
 0x3ff   : > { %v1570_v28 = vpack.c.bf16 %v1560_v25, %v1560_v25  ;;  %v1602_v4 = vunpack.c.l.b16 %v1571_v27 }
 0x401   : > { %v1601_v30 = vunpack.c.l.b16 %v1570_v28 }
 0x403   : > { %v1606_v32 = vsel %vm1605_vm3, %v1601_v30, %v1604_v31 }
 0x404   : > { %v1608_v33 = vsel %vm1607_vm4, %v1602_v4, %v1606_v32 }
 0x405   : > { %v1609_v0 = vpack.c.b16 %v1608_v33, %v1608_v33 }
 0x407   : > { %2361 = vmatmul.mubr.bf16.vlgmr.msra.gmra.mxu0 %v1609_v0 }
 0x4c7   : > { %v1693_v35 = vpop.f32.mrf.mxu0 }
 0x4c8   : > { %v1694_v36 = vadd.f32 %v2088_v34, %v1693_v35 }
 0x4c9   : > { %v2362_v9 = vpop.f32.mrf.mxu0 }
 0x4ca   : > { %v1699_v37 = vpack.c.bf16 %v1694_v36, %v1694_v36 }
 0x4cb   : > { %v1696_v7 = vpop.f32.mrf.mxu0 }
 0x4cc   : > { %2381 = vmatmul.mubr.bf16.vlgmr.msra.gmra.mxu1 %v1699_v37 }
 0x4cd   : > { %v2363_v38 = vpop.f32.mrf.mxu0 }
 0x58c   : > { %v1805_v46 = vpop.f32.mrf.mxu1 }
 0x58d   : > { %v1806_v47 = vadd.f32 %v2097_v44, %v1805_v46 }
 0x58e   : > { %v2382_v48 = vpop.f32.mrf.mxu1 }
 0x58f   : > { %v1818_v49 = vrot.slane %v1806_v47, %v1817_v45 }
 0x590   : > { %v1808_v50 = vpop.f32.mrf.mxu1 }
 0x591   : > { %v1819_v51 = vcombine.high %v1818_v49, %v1818_v49  ;;  %v1826_v52 = vrot.slane %v1818_v49, %v1817_v45  ;;  %2106 = vst.sshfl [vmem:[%s560_s14] sm:$0x1 pattern:$0x73625140] %v1818_v49 }
 0x592   : > { %v2383_v53 = vpop.f32.mrf.mxu1 }
 0x593   : > { %v1833_v54 = vrot.slane %v1819_v51, %v1817_v45  ;;  %v1834_v55 = vcombine.high %v1826_v52, %v1826_v52  ;;  %2107 = vst.sshfl [vmem:[%s560_s14 + $0x1] sm:$0x1 pattern:$0x73625140] %v1819_v51 }
 0x595   : > { %v1835_v56 = vcombine.high %v1833_v54, %v1833_v54  ;;  %1842 = vst [vmem:[%s560_s14 + $0x2] sm:$0x1] %v1834_v55 }
 0x597   : > { %1843 = vst [vmem:[%s560_s14 + $0x3] sm:$0x1] %v1835_v56 }
 0x598   : > { %2784 = shalt.err (!%p2781_p7)
}
 0x599   : > { %s2785_s13 = scalar_lea.hbm %s3312_s5, 64  ;;  %s2789_s25 = scalar_lea.hbm %s3367_s12, 128 }
 0x59a   : > { %p2786_p6 = scmp.ne.s32.totalorder %s3312_s5, %s2785_s13  ;;  %p2790_p10 = scmp.lt.s32.totalorder %s3312_s5, %s3367_s12 }
 0x59b   : > { %p2791_p11 = scmp.lt.s32.totalorder %s2789_s25, %s2785_s13 }
 0x59c   : > { %p2787_p0 = pnand %p2786_p6, %p3411_p9 }
 0x59d   : > { %p2792_p13 = por %p2791_p11, %p2790_p10 }
 0x59e   : > { %p2788_p8 = pneg %p2787_p0 }
 0x5a0   : > { %p2793_p5 = pnand %p2792_p13, %p2788_p8 }
 0x5a2   : > { %2796 = shalt.err (!%p2793_p5)
}
 0x5a3   : > { %s2871_s3 = smov 16   ;;  %s2872_s14 = smov 1  }
 0x5a4   : > { %2412 = dma.vmem_to_hbm [thread:$0]  (%p3411_p9), %s3307_s6, 64, %s3312_s5, %s1845_s10, %s2871_s3, %s2871_s3, %s2872_s14  }
 0x5a5 PF: > { %s1873_s30 = sand.u32 1, %s2843_s21   ;;  %p3412_p1 = scmp.ne.s32.totalorder %s3397_s17, 0 }
 0x5a6   : > { %p3413_p4 = scmp.ge.s32.totalorder %s2855_s24, 2  ;;  %s1874_s15 = scalar_lea.sflag [#allocation4], %s1873_s30 }
 0x5a8   : > { %p2441_p12 = pnand %p3413_p4, %p3412_p1 }
 0x5aa   : > { %p2442_p2 = pneg %p2441_p12 }
 0x5ac   : > { %2838 = dma.done.wait (%p2442_p2), %s1874_s15, 64  }
 0x5ad   : > { %2840 = vsyncadd (%p2442_p2), %s1874_s15, 4294967232  ;;  %s3414_s23 = sld [smem:[#allocation24_spill]]  ;;  %p31_p3 = scmp.ge.s32.totalorder %s3059_s16, 4  }
 0x5ae   : > { %s3415_s28 = sld [smem:[#allocation25_spill]]  ;;  %s3416_s21 = smov %s2847_s22 }
 0x5af   : > { %s3419_s24 = smov %s3059_s16 }
 0x5b0   :  { %33 = sbr.rel (!%p31_p3) target bundleno = 18 (0x12), region = 150 }
 0x5b3   : > { %s3417_s22 = smov %s3414_s23 }
 0x5b4   : > { %s3418_s23 = smov %s3415_s28 }
 0x5b5   :  { %1879 = vsyncpa [#allocation3], 1 }
 0x5b6   :  { %1881 = vsyncpa [#allocation3 + $0x1], 1 }
 0x5b7   :  { %1882 = vsyncpa [#allocation6], 1 }
 0x5b8   :  { %1884 = vsyncpa [#allocation6 + $0x1], 1 }
 0x5b9   :  { %1885 = vsyncpa [#allocation9], 1 }
 0x5ba   :  { %1886 = vsyncpa [#allocation12], 1 }
 0x5bb   :  { %1887 = vsyncpa [#allocation15], 1 }
 0x5bc   :  { %1888 = vsyncpa [#allocation4], 1 }
 0x5bd   :  { %1890 = vsyncpa [#allocation4 + $0x1], 1 }

</bundles_post_ra>
